<compile_context>
chip_gen: v7x
topology: tpu7x:2x2x1
jax: 0.10.0
libtpu: 0.0.40
codegen_flags: <defaults>
</compile_context>

<pallas_src>
import functools

import numpy as np

import jax
import jax.numpy as jnp
from jax import lax
from jax.experimental import pallas as pl
from jax.experimental.pallas import tpu as pltpu

LN_EPS = 1e-5                               # torch.nn.LayerNorm default eps
_MAX_ROW_TILE = 1024                        # upper bound on rows per grid step
_BLOCK_BUDGET = 32 * 1024 * 1024            # bytes for double-buffered blocks (v7x-safe)
_VMEM_LIMIT = 48 * 1024 * 1024              # scoped VMEM limit handed to Mosaic


def _choose_row_tile(r_pad, h, itemsize, n_resident):
    """Largest row tile that is a multiple of 8, divides r_pad, and keeps the
    double-buffered VMEM blocks (n_resident slabs of (tile, H)) under budget."""
    denom = max(1, 2 * n_resident * h * itemsize)
    cap = max(8, (_BLOCK_BUDGET // denom) // 8 * 8)
    t = max(8, min(_MAX_ROW_TILE, cap, r_pad) // 8 * 8)
    while r_pad % t:
        t -= 8
    return t


# ----------------------------------------------------------------------------
# Pallas kernels
# ----------------------------------------------------------------------------
def _dlcl_fused_kernel(slot_ref, wp_ref, x_ref, g_ref, b_ref, hist_ref,
                       out_ref, hslot_ref):
    # slot_ref: (1,) i32 SMEM (only used by the hslot output index_map)
    # wp_ref:   (L+2,) f32 SMEM = [w_0..w_{L-1}, w_new, apply_ln_flag]
    # x_ref:    (tile, H) new raw layer      g_ref/b_ref: (1, H) LN params
    # hist_ref: (L, tile, H) layer history   out_ref: (tile, H) combined
    # hslot_ref:(1, tile, H) new layer written into its history slot (aliased)
    del slot_ref
    n_layers = hist_ref.shape[0]

    x = x_ref[...].astype(jnp.float32)
    # LayerNorm over the hidden dim, one-pass statistics: var = E[x^2] - mean^2.
    mean = jnp.mean(x, axis=-1, keepdims=True)
    var = jnp.mean(x * x, axis=-1, keepdims=True) - mean * mean
    ln_y = ((x - mean) * lax.rsqrt(var + LN_EPS)
            * g_ref[...].astype(jnp.float32) + b_ref[...].astype(jnp.float32))
    flag = wp_ref[n_layers + 1]             # 1.0 -> LayerNorm, 0.0 -> identity
    y = flag * ln_y + (1.0 - flag) * x

    # In-place history update: the new (possibly LN'd) layer goes to its slot.
    hslot_ref[0] = y.astype(hslot_ref.dtype)

    # Weighted combination over the history.  wp_ref[k] is zero for unused
    # slots and for the current slot (its contribution comes from y directly).
    acc = wp_ref[n_layers] * y
    for k in range(n_layers):               # static unroll over layers
        acc = acc + wp_ref[k] * hist_ref[k].astype(jnp.float32)
    out_ref[...] = acc.astype(out_ref.dtype)


def _layernorm_kernel(x_ref, g_ref, b_ref, o_ref):
    # Standalone LayerNorm (post-norm pop path only).
    x = x_ref[...].astype(jnp.float32)
    mean = jnp.mean(x, axis=-1, keepdims=True)
    var = jnp.mean(x * x, axis=-1, keepdims=True) - mean * mean
    o_ref[...] = ((x - mean) * lax.rsqrt(var + LN_EPS)
                  * g_ref[...].astype(jnp.float32)
                  + b_ref[...].astype(jnp.float32)).astype(o_ref.dtype)


# ----------------------------------------------------------------------------
# pallas_call wrappers
# ----------------------------------------------------------------------------
@functools.partial(jax.jit, donate_argnums=(5,))
def _dlcl_fused_call(slot_arr, wp, x2d, gamma, beta, hist):
    """LN(optional) the new layer rows, write them into history slot
    slot_arr[0] in place (aliased buffer), and return the weighted
    combination of the whole history.  Returns (combined, updated_history)."""
    n_layers, r_pad, h = hist.shape
    itemsize = jnp.dtype(hist.dtype).itemsize
    tile_r = _choose_row_tile(r_pad, h, itemsize, n_resident=n_layers + 3)
    grid = (r_pad // tile_r,)

    combined, new_hist = pl.pallas_call(
        _dlcl_fused_kernel,
        out_shape=(
            jax.ShapeDtypeStruct((r_pad, h), hist.dtype),            # combined
            jax.ShapeDtypeStruct((n_layers, r_pad, h), hist.dtype),  # history (aliased)
        ),
        grid_spec=pltpu.PrefetchScalarGridSpec(
            num_scalar_prefetch=1,                                   # slot index
            grid=grid,
            in_specs=[
                pl.BlockSpec(memory_space=pltpu.MemorySpace.SMEM),            # weights+flags
                pl.BlockSpec((tile_r, h), lambda i, s: (i, 0)),               # new layer
                pl.BlockSpec((1, h), lambda i, s: (0, 0)),                    # LN gamma
                pl.BlockSpec((1, h), lambda i, s: (0, 0)),                    # LN beta
                pl.BlockSpec((n_layers, tile_r, h), lambda i, s: (0, i, 0)),  # history
            ],
            out_specs=[
                pl.BlockSpec((tile_r, h), lambda i, s: (i, 0)),               # combined
                pl.BlockSpec((1, tile_r, h), lambda i, s: (s[0], i, 0)),      # new slot
            ],
        ),
        input_output_aliases={5: 1},          # history in == history out buffer
        compiler_params=pltpu.CompilerParams(
            dimension_semantics=("parallel",),
            vmem_limit_bytes=_VMEM_LIMIT,
        ),
    )(slot_arr, wp, x2d, gamma.reshape(1, h), beta.reshape(1, h), hist)
    return combined, new_hist


@jax.jit
def _pallas_layernorm_rows(x2d, gamma, beta):
    r_pad, h = x2d.shape
    tile_r = _choose_row_tile(r_pad, h, jnp.dtype(x2d.dtype).itemsize, n_resident=2)
    return pl.pallas_call(
        _layernorm_kernel,
        out_shape=jax.ShapeDtypeStruct((r_pad, h), x2d.dtype),
        grid=(r_pad // tile_r,),
        in_specs=[
            pl.BlockSpec((tile_r, h), lambda i: (i, 0)),
            pl.BlockSpec((1, h), lambda i: (0, 0)),
            pl.BlockSpec((1, h), lambda i: (0, 0)),
        ],
        out_specs=pl.BlockSpec((tile_r, h), lambda i: (i, 0)),
        compiler_params=pltpu.CompilerParams(
            dimension_semantics=("parallel",),
            vmem_limit_bytes=_VMEM_LIMIT,
        ),
    )(x2d, gamma.reshape(1, h), beta.reshape(1, h))


# ----------------------------------------------------------------------------
# DLCL module (JAX port of the PyTorch state machine)
# ----------------------------------------------------------------------------
class DynamicLinearCombination:
    """pre-norm : x_{l+1} = sum_k W_k^{l+1} LN(y_k)
       post-norm: x_{l+1} = LN(sum_k W_k^{l+1} y_k)"""

    def __init__(self, layer_num, dim, init_value="avg", weight_type="scalar",
                 window_size=-1, normalize_before=True, normalize_embed=False,
                 history_dropout=0.0, normalize_learned_weight=False):
        if weight_type != "scalar":
            # TODO(synk): weight_type 'vector' / 'scalar_X' (per-channel weights) not implemented.
            raise NotImplementedError("only weight_type='scalar' is implemented")
        self.layer_num = layer_num
        self.dim = dim
        self.normalize_before = normalize_before
        self.normalize_embed = normalize_embed
        self.weight_type = weight_type
        self.last_dim = 1
        self.out_dropout = history_dropout
        # TODO(synk): training-mode history_dropout (F.dropout) not implemented; inference only.

        # ---- weight / mask init (matches _init_mask/_init_weight) ----
        mask = np.zeros((layer_num, layer_num), np.float32)
        for i in range(layer_num):
            lo = 0 if window_size == -1 else max(0, i + 1 - window_size)
            mask[i, lo:i + 1] = 1.0
        if init_value == "avg":
            weight = mask / np.sum(mask, axis=1, keepdims=True)
        elif init_value == "one":
            weight = np.ones_like(mask)
        else:
            raise ValueError("unknown init_value:{}".format(init_value))
        if normalize_learned_weight:
            w = np.where(mask == 0, -np.inf, weight)
            w = np.exp(w - np.max(w, axis=1, keepdims=True))
            weight = w / np.sum(w, axis=1, keepdims=True)
        self.np_weight = weight[:, :, None].astype(np.float32)   # (L, L, 1)
        self.np_mask = mask

        # torch LayerNorm default init (gamma=1, beta=0).  Index 0 is identity
        # when normalize_embed=False (dummy params, never applied).
        self.ln_gamma = [jnp.ones((dim,), jnp.float32) for _ in range(layer_num)]
        self.ln_beta = [jnp.zeros((dim,), jnp.float32) for _ in range(layer_num)]

        self.hist = None          # persistent (L, rows_pad, H) history buffer
        self._pending = None      # (rows, slot, apply_ln) pushed but not yet inserted
        self._meta = None
        self.count = 0

    # -- helpers -------------------------------------------------------------
    def _ln_params(self, idx):
        return self.ln_gamma[idx], self.ln_beta[idx]

    def _to_rows(self, layer):
        t, b, h = layer.shape
        r = t * b
        r_pad = -(-r // 8) * 8                  # pad rows to a sublane multiple
        x2d = layer.reshape(r, h)
        if r_pad != r:
            x2d = jnp.pad(x2d, ((0, r_pad - r), (0, 0)))
        return x2d, (t, b, h, r)

    def _ensure_hist(self, rows_shape, dtype):
        shape = (self.layer_num,) + tuple(rows_shape)
        if self.hist is None or self.hist.shape != shape or self.hist.dtype != dtype:
            self.hist = jnp.zeros(shape, dtype)

    def _flush_pending(self):
        # Rare path: push() called again before pop().  Insert the pending layer
        # into its history slot; the (all-zero-weight) combined output is discarded.
        x2d, slot, apply_ln = self._pending
        wp = np.zeros((self.layer_num + 2,), np.float32)
        wp[self.layer_num + 1] = 1.0 if apply_ln else 0.0
        g, b = self._ln_params(slot)
        _, self.hist = _dlcl_fused_call(
            jnp.array([slot], jnp.int32), jnp.asarray(wp), x2d, g, b, self.hist)
        self._pending = None

    # -- public API ----------------------------------------------------------
    def clean(self):
        self.count = 0
        self._pending = None
        # The persistent history buffer is kept; unused slots carry zero weight.

    def push(self, layer):
        slot = self.count
        self.count += 1
        x2d, meta = self._to_rows(layer)
        self._meta = meta
        self._ensure_hist(x2d.shape, x2d.dtype)
        if self._pending is not None:
            self._flush_pending()
        # layer_norms[0] is identity when normalize_embed=False; for k>0 the LN
        # is applied at push time only for pre-norm.
        apply_ln = self.normalize_embed if slot == 0 else self.normalize_before
        self._pending = (x2d, slot, apply_ln)

    def pop(self):
        assert self.count > 0
        L = self.layer_num
        count = self.count
        slot = count - 1
        t, b, h, r = self._meta

        if self._pending is not None:
            x2d, pslot, apply_ln = self._pending
            self._pending = None
        else:
            # Rare path: pop() without a new push — recombine existing history.
            x2d, pslot, apply_ln = self.hist[slot], slot, False

        wp = np.zeros((L + 2,), np.float32)
        wp[:count] = self.np_weight[count - 1, :count, 0]
        wp[L] = wp[pslot]          # weight of the freshly inserted layer
        wp[pslot] = 0.0            # its history slot holds stale data this call
        wp[L + 1] = 1.0 if apply_ln else 0.0

        g, bta = self._ln_params(pslot)
        combined, self.hist = _dlcl_fused_call(
            jnp.array([pslot], jnp.int32), jnp.asarray(wp), x2d, g, bta, self.hist)

        if not self.normalize_before and (count - 1 > 0 or self.normalize_embed):
            g2, b2 = self._ln_params(count - 1)
            combined = _pallas_layernorm_rows(combined, g2, b2)
        # TODO(synk): history_dropout (training-mode F.dropout) not applied here.

        if r != combined.shape[0]:
            combined = combined[:r]
        return combined.reshape(t, b, h)


# ----------------------------------------------------------------------------
# Pure-JAX reference (for correctness check)
# ----------------------------------------------------------------------------
def _ref_layernorm(x, g, b):
    m = jnp.mean(x, -1, keepdims=True)
    v = jnp.mean((x - m) ** 2, -1, keepdims=True)
    return (x - m) / jnp.sqrt(v + LN_EPS) * g + b


def run_reference(raw_layers, dlcl):
    hist, outs = [], []
    for k, y in enumerate(raw_layers):
        g, b = dlcl._ln_params(k)
        apply_ln = dlcl.normalize_embed if k == 0 else dlcl.normalize_before
        hist.append(_ref_layernorm(y, g, b) if apply_ln else y)
        count = k + 1
        w = jnp.asarray(dlcl.np_weight[count - 1, :count, 0])
        out = jnp.sum(jnp.stack(hist, 0) * w[:, None, None, None], axis=0)
        if not dlcl.normalize_before and (count - 1 > 0 or dlcl.normalize_embed):
            g2, b2 = dlcl._ln_params(count - 1)
            out = _ref_layernorm(out, g2, b2)
        outs.append(out)
    return outs


# ----------------------------------------------------------------------------
if __name__ == "__main__":
    H = 32
    encoder_layers = 3
    layer_num = 1 + encoder_layers                     # 4 (embedding + 3 layers)

    key = jax.random.PRNGKey(0)
    keys = jax.random.split(key, 2 * layer_num)

    def run_case(t, b, case_keys):
        raw = [jax.random.normal(k, (t, b, H), jnp.float32) for k in case_keys]
        dlcl = DynamicLinearCombination(layer_num=layer_num, dim=H,
                                        init_value="avg", weight_type="scalar",
                                        normalize_before=True, normalize_embed=False)
        dlcl.clean()
        outs = []
        for y in raw:                                  # fairseq loop: push -> pop
            dlcl.push(y)
            outs.append(dlcl.pop())
        refs = run_reference(raw, dlcl)
        for got, ref in zip(outs, refs):
            got = jax.block_until_ready(got)
            assert got.shape == (t, b, H)
            assert jnp.allclose(got, ref, rtol=1e-4, atol=1e-4), "mismatch vs reference"

    run_case(8, 2, keys[:layer_num])                   # T*B = 16 (no row padding)
    run_case(5, 3, keys[layer_num:])                   # T*B = 15 -> padded-rows path
    print("KERNEL_OK")
</pallas_src>

<mosaic_0001>
module attributes {stable_mosaic.version = 11 : i64} {
  func.func @_dlcl_fused_kernel(%arg0: i32, %arg1: memref<1xi32, #tpu.memory_space<smem>>, %arg2: memref<6xf32, #tpu.memory_space<smem>>, %arg3: memref<16x32xf32, #tpu.memory_space<vmem>>, %arg4: memref<1x32xf32, #tpu.memory_space<vmem>>, %arg5: memref<1x32xf32, #tpu.memory_space<vmem>>, %arg6: memref<4x16x32xf32, #tpu.memory_space<vmem>>, %arg7: memref<16x32xf32, #tpu.memory_space<vmem>>, %arg8: memref<1x16x32xf32, #tpu.memory_space<vmem>>) attributes {dimension_semantics = [#tpu.dimension_semantics<parallel>], iteration_bounds = array<i64: 1>, scalar_prefetch = 1 : i64, scratch_operands = 0 : i64, tpu.core_type = #tpu.core_type<tc>, window_params = [{transform_indices = @transform_0, window_bounds = array<i64: 6>}, {transform_indices = @transform_1, window_bounds = array<i64: 16, 32>}, {pipeline_mode = #tpu.pipeline_mode<synchronous>, transform_indices = @transform_2, window_bounds = array<i64: 1, 32>}, {pipeline_mode = #tpu.pipeline_mode<synchronous>, transform_indices = @transform_3, window_bounds = array<i64: 1, 32>}, {transform_indices = @transform_4, window_bounds = array<i64: 4, 16, 32>}, {transform_indices = @transform_5, window_bounds = array<i64: 16, 32>}, {transform_indices = @transform_6, window_bounds = array<i64: 1, 16, 32>}]} {
    %c0 = arith.constant 0 : index
    %c0_0 = arith.constant 0 : index
    %0 = vector.load %arg3[%c0, %c0_0] : memref<16x32xf32, #tpu.memory_space<vmem>>, vector<16x32xf32>
    %cst = arith.constant dense<0.000000e+00> : vector<16xf32>
    %1 = vector.multi_reduction <add>, %0, %cst [1] : vector<16x32xf32> to vector<16xf32>
    %2 = vector.shape_cast %1 : vector<16xf32> to vector<16x1xf32>
    %cst_1 = arith.constant 3.200000e+01 : f32
    %3 = vector.broadcast %cst_1 : f32 to vector<16x1xf32>
    %4 = arith.divf %2, %3 : vector<16x1xf32>
    %5 = arith.mulf %0, %0 : vector<16x32xf32>
    %cst_2 = arith.constant dense<0.000000e+00> : vector<16xf32>
    %6 = vector.multi_reduction <add>, %5, %cst_2 [1] : vector<16x32xf32> to vector<16xf32>
    %7 = vector.shape_cast %6 : vector<16xf32> to vector<16x1xf32>
    %cst_3 = arith.constant 3.200000e+01 : f32
    %8 = vector.broadcast %cst_3 : f32 to vector<16x1xf32>
    %9 = arith.divf %7, %8 : vector<16x1xf32>
    %10 = arith.mulf %4, %4 : vector<16x1xf32>
    %11 = arith.subf %9, %10 : vector<16x1xf32>
    %12 = vector.broadcast %4 : vector<16x1xf32> to vector<16x32xf32>
    %13 = arith.subf %0, %12 : vector<16x32xf32>
    %cst_4 = arith.constant 9.99999974E-6 : f32
    %14 = vector.broadcast %cst_4 : f32 to vector<16x1xf32>
    %15 = arith.addf %11, %14 : vector<16x1xf32>
    %16 = math.rsqrt %15 : vector<16x1xf32>
    %17 = vector.broadcast %16 : vector<16x1xf32> to vector<16x32xf32>
    %18 = arith.mulf %13, %17 : vector<16x32xf32>
    %c0_5 = arith.constant 0 : index
    %c0_6 = arith.constant 0 : index
    %19 = vector.load %arg4[%c0_5, %c0_6] : memref<1x32xf32, #tpu.memory_space<vmem>>, vector<1x32xf32>
    %20 = vector.broadcast %19 : vector<1x32xf32> to vector<16x32xf32>
    %21 = arith.mulf %18, %20 : vector<16x32xf32>
    %c0_7 = arith.constant 0 : index
    %c0_8 = arith.constant 0 : index
    %22 = vector.load %arg5[%c0_7, %c0_8] : memref<1x32xf32, #tpu.memory_space<vmem>>, vector<1x32xf32>
    %23 = vector.broadcast %22 : vector<1x32xf32> to vector<16x32xf32>
    %24 = arith.addf %21, %23 : vector<16x32xf32>
    %c5 = arith.constant 5 : index
    %25 = memref.load %arg2[%c5] : memref<6xf32, #tpu.memory_space<smem>>
    %26 = vector.broadcast %25 : f32 to vector<16x32xf32>
    %27 = arith.mulf %26, %24 : vector<16x32xf32>
    %cst_9 = arith.constant 1.000000e+00 : f32
    %28 = arith.subf %cst_9, %25 : f32
    %29 = vector.broadcast %28 : f32 to vector<16x32xf32>
    %30 = arith.mulf %29, %0 : vector<16x32xf32>
    %31 = arith.addf %27, %30 : vector<16x32xf32>
    %c0_10 = arith.constant 0 : index
    %c0_11 = arith.constant 0 : index
    %c0_12 = arith.constant 0 : index
    %32 = vector.load %arg8[%c0_10, %c0_11, %c0_12] : memref<1x16x32xf32, #tpu.memory_space<vmem>>, vector<1x16x32xf32>
    %33 = vector.shape_cast %32 : vector<1x16x32xf32> to vector<16x32xf32>
    %34 = vector.shape_cast %31 : vector<16x32xf32> to vector<1x16x32xf32>
    tpu.vector_store %arg8[%c0_10, %c0_11, %c0_12], %34 {strides = array<i32>} : memref<1x16x32xf32, #tpu.memory_space<vmem>>, vector<1x16x32xf32>,
    %c4 = arith.constant 4 : index
    %35 = memref.load %arg2[%c4] : memref<6xf32, #tpu.memory_space<smem>>
    %36 = vector.broadcast %35 : f32 to vector<16x32xf32>
    %37 = arith.mulf %36, %31 : vector<16x32xf32>
    %c0_13 = arith.constant 0 : index
    %38 = memref.load %arg2[%c0_13] : memref<6xf32, #tpu.memory_space<smem>>
    %c0_14 = arith.constant 0 : index
    %c0_15 = arith.constant 0 : index
    %c0_16 = arith.constant 0 : index
    %39 = vector.load %arg6[%c0_14, %c0_15, %c0_16] : memref<4x16x32xf32, #tpu.memory_space<vmem>>, vector<1x16x32xf32>
    %40 = vector.shape_cast %39 : vector<1x16x32xf32> to vector<16x32xf32>
    %41 = vector.broadcast %38 : f32 to vector<16x32xf32>
    %42 = arith.mulf %41, %40 : vector<16x32xf32>
    %43 = arith.addf %37, %42 : vector<16x32xf32>
    %c1 = arith.constant 1 : index
    %44 = memref.load %arg2[%c1] : memref<6xf32, #tpu.memory_space<smem>>
    %c1_17 = arith.constant 1 : index
    %c0_18 = arith.constant 0 : index
    %c0_19 = arith.constant 0 : index
    %45 = vector.load %arg6[%c1_17, %c0_18, %c0_19] : memref<4x16x32xf32, #tpu.memory_space<vmem>>, vector<1x16x32xf32>
    %46 = vector.shape_cast %45 : vector<1x16x32xf32> to vector<16x32xf32>
    %47 = vector.broadcast %44 : f32 to vector<16x32xf32>
    %48 = arith.mulf %47, %46 : vector<16x32xf32>
    %49 = arith.addf %43, %48 : vector<16x32xf32>
    %c2 = arith.constant 2 : index
    %50 = memref.load %arg2[%c2] : memref<6xf32, #tpu.memory_space<smem>>
    %c2_20 = arith.constant 2 : index
    %c0_21 = arith.constant 0 : index
    %c0_22 = arith.constant 0 : index
    %51 = vector.load %arg6[%c2_20, %c0_21, %c0_22] : memref<4x16x32xf32, #tpu.memory_space<vmem>>, vector<1x16x32xf32>
    %52 = vector.shape_cast %51 : vector<1x16x32xf32> to vector<16x32xf32>
    %53 = vector.broadcast %50 : f32 to vector<16x32xf32>
    %54 = arith.mulf %53, %52 : vector<16x32xf32>
    %55 = arith.addf %49, %54 : vector<16x32xf32>
    %c3 = arith.constant 3 : index
    %56 = memref.load %arg2[%c3] : memref<6xf32, #tpu.memory_space<smem>>
    %c3_23 = arith.constant 3 : index
    %c0_24 = arith.constant 0 : index
    %c0_25 = arith.constant 0 : index
    %57 = vector.load %arg6[%c3_23, %c0_24, %c0_25] : memref<4x16x32xf32, #tpu.memory_space<vmem>>, vector<1x16x32xf32>
    %58 = vector.shape_cast %57 : vector<1x16x32xf32> to vector<16x32xf32>
    %59 = vector.broadcast %56 : f32 to vector<16x32xf32>
    %60 = arith.mulf %59, %58 : vector<16x32xf32>
    %61 = arith.addf %55, %60 : vector<16x32xf32>
    %c0_26 = arith.constant 0 : index
    %c0_27 = arith.constant 0 : index
    %62 = vector.load %arg7[%c0_26, %c0_27] : memref<16x32xf32, #tpu.memory_space<vmem>>, vector<16x32xf32>
    tpu.vector_store %arg7[%c0_26, %c0_27], %61 {strides = array<i32>} : memref<16x32xf32, #tpu.memory_space<vmem>>, vector<16x32xf32>,
    return
  }
  func.func @transform_0(%arg0: i32, %arg1: memref<1xi32, #tpu.memory_space<smem>>) -> i32 {
    %c0_i32 = arith.constant 0 : i32
    %c0_i32_0 = arith.constant 0 : i32
    return %c0_i32 : i32
  }
  func.func @transform_1(%arg0: i32, %arg1: memref<1xi32, #tpu.memory_space<smem>>) -> (i32, i32) {
    %c0_i32 = arith.constant 0 : i32
    %c0_i32_0 = arith.constant 0 : i32
    return %arg0, %c0_i32 : i32, i32
  }
  func.func @transform_2(%arg0: i32, %arg1: memref<1xi32, #tpu.memory_space<smem>>) -> (i32, i32) {
    %c0_i32 = arith.constant 0 : i32
    %c0_i32_0 = arith.constant 0 : i32
    %c0_i32_1 = arith.constant 0 : i32
    return %c0_i32, %c0_i32_0 : i32, i32
  }
  func.func @transform_3(%arg0: i32, %arg1: memref<1xi32, #tpu.memory_space<smem>>) -> (i32, i32) {
    %c0_i32 = arith.constant 0 : i32
    %c0_i32_0 = arith.constant 0 : i32
    %c0_i32_1 = arith.constant 0 : i32
    return %c0_i32, %c0_i32_0 : i32, i32
  }
  func.func @transform_4(%arg0: i32, %arg1: memref<1xi32, #tpu.memory_space<smem>>) -> (i32, i32, i32) {
    %c0_i32 = arith.constant 0 : i32
    %c0_i32_0 = arith.constant 0 : i32
    %c0_i32_1 = arith.constant 0 : i32
    return %c0_i32, %arg0, %c0_i32_0 : i32, i32, i32
  }
  func.func @transform_5(%arg0: i32, %arg1: memref<1xi32, #tpu.memory_space<smem>>) -> (i32, i32) {
    %c0_i32 = arith.constant 0 : i32
    %c0_i32_0 = arith.constant 0 : i32
    return %arg0, %c0_i32 : i32, i32
  }
  func.func @transform_6(%arg0: i32, %arg1: memref<1xi32, #tpu.memory_space<smem>>) -> (i32, i32, i32) {
    %c0 = arith.constant 0 : index
    %0 = memref.load %arg1[%c0] : memref<1xi32, #tpu.memory_space<smem>>
    %c0_i32 = arith.constant 0 : i32
    %c0_i32_0 = arith.constant 0 : i32
    return %0, %arg0, %c0_i32 : i32, i32, i32
  }
}

</mosaic_0001>

<bundles_post_ra>
// kernel: _dlcl_fused_call.1
= control target key start
LH: loop header
LB: loop body
LE: loop exit
PB: predicated region body
PF: predicated region fallthrough
CT: control target
= control target key end

     0   :  { %14 = vsyncpa [#allocation7], 0  ;;  %s497_s0 = inlined_call_operand.<no memory space> [shape: s32[1], index: 0, kind: input, shape index: {}]   ;;  %s498_s1 = inlined_call_operand.vmem [shape: f32[6], index: 1, kind: input, shape index: {}]   ;;  %s499_s2 = inlined_call_operand.hbm [shape: f32[16,32], index: 2, kind: input, shape index: {}]   ;;  %s500_s3 = inlined_call_operand.vmem [shape: f32[1,32], index: 3, kind: input, shape index: {}]   ;;  %s501_s4 = inlined_call_operand.vmem [shape: f32[1,32], index: 4, kind: input, shape index: {}]   ;;  %s502_s5 = inlined_call_operand.hbm [shape: f32[4,16,32], index: 5, kind: input, shape index: {}, may-alias: {5,7}]   ;;  %s503_s6 = inlined_call_operand.hbm [shape: f32[16,32], index: 6, kind: output, shape index: {0}]   ;;  %s504_s7 = inlined_call_operand.hbm [shape: f32[4,16,32], index: 7, kind: output, shape index: {1}, may-alias: {5,7}]  }
   0x1   :  { %15 = vsyncpa [#allocation5], 0 }
   0x2   :  { %16 = vsyncpa [#allocation10], 0 }
   0x3   :  { %17 = vsyncpa [#allocation6], 0 }
   0x4   :  { %18 = vsyncpa [#allocation13], 0  ;;  %s25_s26 = sshll.u32 %s498_s1, 4  ;;  %s26_s26 = int_to_ptr.vmem [resolvable:$true] %s25_s26 }
   0x5   :  { %s235_s27 = scalar_lea.vmem %s26_s26, 16  ;;  %p240_p1 = scmp.lt.s32.totalorder %s26_s26, %s26_s26 }
   0x6   :  { %p236_p0 = scmp.ne.s32.totalorder %s26_s26, %s235_s27  ;;  %p241_p2 = scmp.lt.s32.totalorder %s235_s27, %s235_s27 }
   0x8   :  { %p242_p3 = por %p241_p2, %p240_p1 }
   0xa   :  { %p243_p4 = pnand %p242_p3, %p236_p0 }
   0xc   :  { %246 = shalt.err (!%p243_p4)
}
   0xd   :  { %s347_s28 = smov [#allocation4]   ;;  %s348_s29 = smov [#allocation8]  }
   0xe   :  { %28 = dma.vmem_to_smem %s26_s26, 16, %s347_s28, [#allocation7]  }
   0xf   :  { %s34_s30 = sshll.u32 %s348_s29, 4  ;;  %s247_s10 = scalar_lea.hbm %s499_s2, 256  ;;  %s35_s30 = int_to_ptr.vmem [resolvable:$true] %s34_s30 }
  0x10   :  { %p248_p5 = scmp.ne.s32.totalorder %s499_s2, %s247_s10  ;;  %p251_p6 = scmp.lt.u32.totalorder %s247_s10, %s499_s2 }
  0x12   :  { %p253_p7 = pnand %p251_p6, %p248_p5 }
  0x14   :  { %256 = shalt.err (!%p253_p7)
}
  0x15   :  { %s257_s14 = scalar_lea.vmem %s35_s30, 256  ;;  %p262_p9 = scmp.lt.s32.totalorder %s35_s30, %s35_s30 }
  0x16   :  { %p258_p8 = scmp.ne.s32.totalorder %s35_s30, %s257_s14  ;;  %p263_p10 = scmp.lt.s32.totalorder %s257_s14, %s257_s14 }
  0x18   :  { %p264_p11 = por %p263_p10, %p262_p9 }
  0x1a   :  { %p265_p12 = pnand %p264_p11, %p258_p8 }
  0x1c   :  { %268 = shalt.err (!%p265_p12)
}
  0x1d   :  { %s349_s15 = smov 128   ;;  %s350_s16 = smov 8  }
  0x1e   :  { %40 = dma.hbm_to_vmem [thread:$0]  %s499_s2, 256, %s35_s30, [#allocation5], %s349_s15, %s349_s15, %s350_s16  }
  0x1f   :  { %s351_s19 = smov [#allocation9]   ;;  %s269_s23 = scalar_lea.hbm %s502_s5, 1024 }
  0x20   :  { %s50_s20 = sshll.u32 %s351_s19, 4  ;;  %p270_p13 = scmp.ne.s32.totalorder %s502_s5, %s269_s23  ;;  %s51_s20 = int_to_ptr.vmem [resolvable:$true] %s50_s20 }
  0x21   :  { %p273_p0 = scmp.lt.u32.totalorder %s269_s23, %s502_s5 }
  0x23   :  { %p275_p1 = pnand %p273_p0, %p270_p13 }
  0x25   :  { %278 = shalt.err (!%p275_p1)
}
  0x26   :  { %s279_s28 = scalar_lea.vmem %s51_s20, 1024  ;;  %p284_p3 = scmp.lt.s32.totalorder %s51_s20, %s51_s20 }
  0x27   :  { %p280_p2 = scmp.ne.s32.totalorder %s51_s20, %s279_s28  ;;  %p285_p4 = scmp.lt.s32.totalorder %s279_s28, %s279_s28 }
  0x29   :  { %p286_p5 = por %p285_p4, %p284_p3 }
  0x2b   :  { %p287_p6 = pnand %p286_p5, %p280_p2 }
  0x2d   :  { %290 = shalt.err (!%p287_p6)
}
  0x2e   :  { %56 = dma.hbm_to_vmem [thread:$0]  %s502_s5, 1024, %s51_s20, [#allocation10], %s349_s15, %s349_s15, %s350_s16  }
  0x2f   :  { %337 = dma.done.wait [#allocation7], 16  }
  0x30   :  { %338 = vsyncadd [#allocation7], 4294967280 }
  0x31   :  { %339 = dma.done.wait [#allocation5], 256  }
  0x32   :  { %340 = vsyncadd [#allocation5], 4294967040 }
  0x33   :  { %341 = dma.done.wait [#allocation10], 1024  }
  0x34   :  { %342 = vsyncadd [#allocation10], 4294966272 }
  0x35   :  { %66 = sfence }
  0x36   :  { %v68_v0 = vld [vmem:[#allocation8] sm:$0xff]  ;;  %vm70_vm0 = vcmask 261120   ;;  %v69_v1 = vld [vmem:[#allocation8 + $0x8] sm:$0xff]  ;;  %s431_s5 = sld [smem:[#allocation4 + $0x5]]  ;;  %s434_s8 = sld [smem:[#allocation4]]  ;;  %v137_v35 = vld [vmem:[#allocation9] sm:$0xff] }
  0x37   :  { %v71_v2 = vsel %vm70_vm0, %v68_v0, 0.0  ;;  %v80_v3 = vmul.f32 %v68_v0, %v68_v0  ;;  %v81_v4 = vmul.f32 %v69_v1, %v69_v1  ;;  %v74_v6 = vsel %vm70_vm0, %v69_v1, 0.0  ;;  %v214_v24 = vld [vmem:[%s500_s3] ss:$0 sm:$0xff]  ;;  %s439_s11 = sld [smem:[#allocation4 + $0x4]]  ;;  %s441_s12 = sld [smem:[#allocation4 + $0x1]] }
  0x38   :  { %72 = vadd.xlane.f32.xlu0 %v71_v2  ;;  %v215_v27 = vld [vmem:[%s501_s4] ss:$0 sm:$0xff]  ;;  %s446_s14 = sld [smem:[#allocation4 + $0x2]]  ;;  %s449_s3 = sld [smem:[#allocation4 + $0x3]]  ;;  %v138_v46 = vld [vmem:[#allocation9 + $0x8] sm:$0xff]  ;;  %v155_v47 = vld [vmem:[#allocation9 + $0x20] sm:$0xff] }
  0x39   :  { %v82_v5 = vsel %vm70_vm0, %v80_v3, 0.0  ;;  %v85_v7 = vsel %vm70_vm0, %v81_v4, 0.0  ;;  %v146_v40 = vld [vmem:[#allocation9 + $0x10] sm:$0xff]  ;;  %s223_s18 = sshll.u32 %s497_s0, 8  ;;  %s352_s19 = smov [#allocation12]   ;;  %v147_v52 = vld [vmem:[#allocation9 + $0x18] sm:$0xff] }
  0x3a   :  { %83 = vadd.xlane.f32.xlu1 %v82_v5  ;;  %s194_s20 = sshll.u32 %s352_s19, 4  ;;  %v164_v53 = vld [vmem:[#allocation9 + $0x30] sm:$0xff]  ;;  %s463_s23 = scalar_lea.hbm %s504_s7, %s223_s18  ;;  %v156_v59 = vld [vmem:[#allocation9 + $0x28] sm:$0xff]  ;;  %s195_s20 = int_to_ptr.vmem [resolvable:$true] %s194_s20 }
  0x3b   :  { %s291_s0 = scalar_lea.vmem %s195_s20, 256  ;;  %p296_p8 = scmp.lt.s32.totalorder %s195_s20, %s195_s20 }
  0x3c   :  { %75 = vadd.xlane.f32.xlu0 %v74_v6  ;;  %s124_s30 = ssub.f32 1.0, %s431_s5  ;;  %v121_v31 = vstv %s431_s5  ;;  %v139_v36 = vstv %s434_s8  ;;  %p292_p7 = scmp.ne.s32.totalorder %s195_s20, %s291_s0 }
  0x3d   :  { %v133_v39 = vstv %s439_s11  ;;  %v148_v41 = vstv %s441_s12  ;;  %v140_v45 = vmul.f32 %v139_v36, %v137_v35  ;;  %v141_v56 = vmul.f32 %v139_v36, %v138_v46  ;;  %p297_p9 = scmp.lt.s32.totalorder %s291_s0, %s291_s0 }
  0x3e   :  { %86 = vadd.xlane.f32.xlu1 %v85_v7  ;;  %v125_v26 = vstv %s124_s30  ;;  %v157_v48 = vstv %s446_s14  ;;  %v149_v51 = vmul.f32 %v148_v41, %v146_v40  ;;  %v166_v54 = vstv %s449_s3 }
  0x3f   :  { %v126_v32 = vmul.f32 %v125_v26, %v68_v0  ;;  %v127_v42 = vmul.f32 %v125_v26, %v69_v1  ;;  %v158_v58 = vmul.f32 %v157_v48, %v155_v47  ;;  %v150_v61 = vmul.f32 %v148_v41, %v147_v52  ;;  %p298_p10 = por %p297_p9, %p296_p8 }
  0x40   :  { %v167_v63 = vmul.f32 %v166_v54, %v164_v53 }
  0x41   :  { %p299_p11 = pnand %p298_p10, %p292_p7 }
  0xc5   :  { %v73_v8 = vpop.xlane.xlu0 %72 }
  0xc6   :  { %v78_v9 = vmul.f32 0.03125, %v73_v8 }
  0xc7   :  { %v84_v10 = vpop.xlane.xlu1 %83 }
  0xc8   :  { %v90_v11 = vmul.f32 %v78_v9, %v78_v9  ;;  %v88_v12 = vmul.f32 0.03125, %v84_v10  ;;  %v94_v22 = vsub.f32 %v68_v0, %v78_v9  ;;  %v165_v0 = vld [vmem:[#allocation9 + $0x38] sm:$0xff] }
  0xc9   :  { %v76_v13 = vpop.xlane.xlu0 %75 }
  0xca   :  { %v92_v14 = vsub.f32 %v88_v12, %v90_v11  ;;  %v79_v15 = vmul.f32 0.03125, %v76_v13 }
  0xcb   :  { %v87_v16 = vpop.xlane.xlu1 %86 }
  0xcc   :  { %v96_v17 = vadd.f32 1e-05, %v92_v14  ;;  %v91_v18 = vmul.f32 %v79_v15, %v79_v15  ;;  %v89_v19 = vmul.f32 0.03125, %v87_v16  ;;  %v95_v29 = vsub.f32 %v69_v1, %v79_v15 }
  0xce   :  { %231 = vrsqrt.f32 %v96_v17  ;;  %v93_v20 = vsub.f32 %v89_v19, %v91_v18 }
  0xd0   :  { %v97_v21 = vadd.f32 1e-05, %v93_v20 }
  0xd2   :  { %233 = vrsqrt.f32 %v97_v21 }
  0xd8   :  { %v232_v23 = vpop.eup %231 }
  0xd9   :  { %v100_v25 = vmul.f32 %v232_v23, %v94_v22 }
  0xdb   :  { %v109_v28 = vmul.f32 %v214_v24, %v100_v25 }
  0xdc   :  { %v234_v30 = vpop.eup %233 }
  0xdd   :  { %v101_v33 = vmul.f32 %v234_v30, %v95_v29  ;;  %v118_v34 = vadd.f32 %v215_v27, %v109_v28 }
  0xdf   :  { %v110_v37 = vmul.f32 %v214_v24, %v101_v33  ;;  %v122_v38 = vmul.f32 %v121_v31, %v118_v34 }
  0xe1   :  { %v119_v43 = vadd.f32 %v215_v27, %v110_v37  ;;  %v128_v44 = vadd.f32 %v126_v32, %v122_v38 }
  0xe3   :  { %v123_v49 = vmul.f32 %v121_v31, %v119_v43  ;;  %v134_v50 = vmul.f32 %v133_v39, %v128_v44  ;;  %130 = vst.msk [vmem:[#allocation12] sm:$0xff] %vm70_vm0, %v128_v44 }
  0xe5   :  { %v129_v55 = vadd.f32 %v127_v42, %v123_v49  ;;  %v142_v57 = vadd.f32 %v140_v45, %v134_v50 }
  0xe7   :  { %v135_v60 = vmul.f32 %v133_v39, %v129_v55  ;;  %v151_v62 = vadd.f32 %v149_v51, %v142_v57  ;;  %131 = vst.msk [vmem:[#allocation12 + $0x8] sm:$0xff] %vm70_vm0, %v129_v55 }
  0xe8   :  { %302 = shalt.err (!%p299_p11)
}
  0xe9   :  { %s303_s24 = scalar_lea.hbm %s463_s23, 256  ;;  %s305_s27 = scalar_lea.hbm %s504_s7, 1024 }
  0xea   :  { %p304_p12 = scmp.ne.s32.totalorder %s463_s23, %s303_s24  ;;  %p306_p13 = scmp.lt.u32.totalorder %s463_s23, %s504_s7 }
  0xeb   :  { %p307_p0 = scmp.lt.u32.totalorder %s305_s27, %s303_s24  ;;  %p309_p2 = scmp.lt.u32.totalorder %s303_s24, %s463_s23 }
  0xed   :  { %p308_p1 = por %p307_p0, %p306_p13 }
  0xef   :  { %p310_p3 = por %p309_p2, %p308_p1 }
  0xf1   :  { %p311_p4 = pnand %p310_p3, %p304_p12 }
  0xf3   :  { %314 = shalt.err (!%p311_p4)
}
  0xf4   :  { %200 = dma.vmem_to_hbm [thread:$0]  %s195_s20, 256, %s463_s23, [#allocation13], %s349_s15, %s349_s15, %s350_s16   ;;  %v143_v1 = vadd.f32 %v141_v56, %v135_v60  ;;  %v159_v2 = vmul.f32 %v157_v48, %v156_v59  ;;  %v160_v3 = vadd.f32 %v158_v58, %v151_v62  ;;  %v168_v5 = vmul.f32 %v166_v54, %v165_v0 }
  0xf5   :  { %s353_s29 = smov [#allocation11]  }
  0xf6   :  { %v152_v4 = vadd.f32 %v150_v61, %v143_v1  ;;  %v169_v6 = vadd.f32 %v167_v63, %v160_v3  ;;  %s178_s5 = sshll.u32 %s353_s29, 4  ;;  %s179_s5 = int_to_ptr.vmem [resolvable:$true] %s178_s5 }
  0xf7   :  { %s315_s7 = scalar_lea.vmem %s179_s5, 256  ;;  %p320_p6 = scmp.lt.s32.totalorder %s179_s5, %s179_s5 }
  0xf8   :  { %v161_v7 = vadd.f32 %v159_v2, %v152_v4  ;;  %171 = vst.msk [vmem:[#allocation11] sm:$0xff] %vm70_vm0, %v169_v6  ;;  %p316_p5 = scmp.ne.s32.totalorder %s179_s5, %s315_s7  ;;  %p321_p7 = scmp.lt.s32.totalorder %s315_s7, %s315_s7 }
  0xfa   :  { %v170_v8 = vadd.f32 %v168_v5, %v161_v7  ;;  %p322_p8 = por %p321_p7, %p320_p6 }
  0xfc   :  { %172 = vst.msk [vmem:[#allocation11 + $0x8] sm:$0xff] %vm70_vm0, %v170_v8  ;;  %p323_p9 = pnand %p322_p8, %p316_p5 }
  0xfe   :  { %326 = shalt.err (!%p323_p9)
}
  0xff   :  { %s327_s9 = scalar_lea.hbm %s503_s6, 256 }
 0x100   :  { %p328_p10 = scmp.ne.s32.totalorder %s503_s6, %s327_s9  ;;  %p331_p11 = scmp.lt.u32.totalorder %s327_s9, %s503_s6 }
 0x102   :  { %p333_p12 = pnand %p331_p11, %p328_p10 }
 0x104   :  { %336 = shalt.err (!%p333_p12)
}
 0x105   :  { %184 = dma.vmem_to_hbm [thread:$0]  %s179_s5, 256, %s503_s6, [#allocation6], %s349_s15, %s349_s15, %s350_s16  }
 0x106   :  { %343 = dma.done.wait [#allocation6], 256  }
 0x107   :  { %344 = vsyncadd [#allocation6], 4294967040 }
 0x108   :  { %345 = dma.done.wait [#allocation13], 256  }
 0x109   :  { %346 = vsyncadd [#allocation13], 4294967040 }
 0x10a   :  { %207 = vsyncpa [#allocation5], 1 }
 0x10b   :  { %208 = vsyncpa [#allocation10], 1 }
 0x10c   :  { %209 = vsyncpa [#allocation6], 1 }
 0x10d   :  { %210 = vsyncpa [#allocation13], 1 }
 0x10e   :  { %211 = vsyncpa [#allocation7], 1 }

</bundles_post_ra>
